<compile_context>
chip_gen: v7x
topology: tpu7x:2x2x1
jax: 0.10.0
libtpu: 0.0.40
codegen_flags: <defaults>
</compile_context>

<pallas_src>
import jax
import jax.numpy as jnp
from jax.experimental import pallas as pl
from jax.experimental.pallas import tpu as pltpu


def _round_up(x, m):
    return ((x + m - 1) // m) * m


def _cdiv(a, b):
    return -(-a // b)


def _vmem_limit_bytes():
    """Generation-aware scoped-VMEM limit (leaves pipeline headroom)."""
    cap = 64 << 20          # conservative fallback (v7x per-TC physical VMEM)
    try:
        info = pltpu.get_tpu_info()
        cap = int(getattr(info, "vmem_capacity_bytes", cap))
    except Exception:
        pass
    # ~3/4 of physical, never more than 112 MiB (v5e/v6e have 128 MiB).
    return int(min(cap * 3 // 4, 112 << 20))


def _choose_tiling(B, S, in_itemsize, vmem_limit, tile_b_cap):
    """Pick (tb, m_chunk, n_chunk) so live temporaries stay inside VMEM."""
    # n chunk is the lane axis of the pair slab (multiple of 128 when S allows),
    # m chunk the sublane axis (multiple of 8 when S allows).
    n_chunk = S if S <= 256 else 256
    m_chunk = S if S <= 128 else 128

    # Per batch-row VMEM cost:
    #   - pairwise temporaries: ~6 live f32 copies of (m_chunk, n_chunk)
    #   - resident f32 row copies (preds/labels/masked/keep): ~6 * S
    #   - double-buffered input blocks (2 inputs x 2 buffers) in native dtype
    per_row_pair = 6 * 4 * m_chunk * n_chunk
    per_row_fixed = 6 * 4 * S + 2 * 2 * in_itemsize * S
    budget = max(vmem_limit // 2, 1 << 20)
    tb = budget // max(per_row_pair + per_row_fixed, 1)
    tb = max(8, min(tb, tile_b_cap, _round_up(B, 8)))
    tb = max(8, (tb // 8) * 8)
    return tb, m_chunk, n_chunk


def _make_rank_loss_kernel(tb, S, m_chunk, n_chunk):
    n_m = _cdiv(S, m_chunk)
    n_n = _cdiv(S, n_chunk)

    def kernel(pred_ref, label_ref, out_ref):
        preds = pred_ref[...].astype(jnp.float32)      # (tb, S)
        labels = label_ref[...].astype(jnp.float32)    # (tb, S)

        keep = labels != -1.0                          # (tb, S) bool, -1 = ignore
        pm = jnp.where(keep, preds, 0.0)               # predictions_masked
        lm = jnp.where(keep, labels, 0.0)              # labels_masked

        row_total = jnp.zeros((tb,), jnp.float32)

        # Static (unrolled at trace time) chunk loops over the (m, n) plane.
        for mi in range(n_m):
            m0 = mi * m_chunk
            m1 = min(S, m0 + m_chunk)
            mt = m1 - m0
            pm_m = pm[:, m0:m1]                        # (tb, mt)
            lm_m = lm[:, m0:m1]
            for ni in range(n_n):
                n0 = ni * n_chunk
                n1 = min(S, n0 + n_chunk)
                if n1 - 1 <= m0:
                    # Chunk lies entirely at/below the diagonal: no n > m pairs.
                    continue
                nt = n1 - n0
                pm_n = pm[:, n0:n1]                    # (tb, nt)
                lm_n = lm[:, n0:n1]
                keep_n = keep[:, n0:n1]

                pd = pm_m[:, :, None] - pm_n[:, None, :]   # (tb, mt, nt)
                ld = lm_m[:, :, None] - lm_n[:, None, :]

                # sign(ld) * pd without materializing sign():
                signed = jnp.where(ld > 0.0, pd,
                                   jnp.where(ld < 0.0, -pd, 0.0))
                hinge = jnp.maximum(1.0 - signed, 0.0)     # relu hinge

                if n0 < m1:
                    # Chunk straddles the diagonal: fold the (small, (mt,nt))
                    # triangular mask with the n-position mask in one select.
                    rows = jax.lax.broadcasted_iota(jnp.int32, (mt, nt), 0) + m0
                    cols = jax.lax.broadcasted_iota(jnp.int32, (mt, nt), 1) + n0
                    mask = (cols > rows)[None, :, :] & keep_n[:, None, :]
                else:
                    # Entirely above the diagonal: only the n-position mask.
                    mask = keep_n[:, None, :]
                term = jnp.where(mask, hinge, 0.0)

                # Lane reduce then sublane reduce -> per-sentence partial sum.
                row_total = row_total + jnp.sum(jnp.sum(term, axis=2), axis=1)

        out_ref[...] = row_total[:, None]              # (tb, 1)

    return kernel


def rank_depth_loss(predictions, label_batch, length_batch, *, tile_b=512):
    """Pallas equivalent of RankDepthLoss.forward.

    Args:
      predictions:  (B, S) predicted depths (any float dtype).
      label_batch:  (B, S) true depths (-1 = ignore).
      length_batch: (B,)   sentence lengths.

    Returns:
      (batch_loss, total_sents) as float32 scalars.
    """
    B, S = predictions.shape

    vmem_limit = _vmem_limit_bytes()
    tb, m_chunk, n_chunk = _choose_tiling(
        B, S, jnp.dtype(predictions.dtype).itemsize, vmem_limit, tile_b)

    b_pad = _round_up(B, tb)
    if b_pad != B:
        pad = b_pad - B
        # Pad rows: label=-1 everywhere -> fully masked -> rank_loss == 0.
        predictions = jnp.pad(predictions, ((0, pad), (0, 0)))
        label_batch = jnp.pad(label_batch, ((0, pad), (0, 0)),
                              constant_values=-1)

    grid = (b_pad // tb,)
    kernel = _make_rank_loss_kernel(tb, S, m_chunk, n_chunk)

    per_row = pl.pallas_call(
        kernel,
        out_shape=jax.ShapeDtypeStruct((b_pad, 1), jnp.float32),
        grid_spec=pltpu.PrefetchScalarGridSpec(
            num_scalar_prefetch=0,
            grid=grid,
            in_specs=[
                pl.BlockSpec((tb, S), lambda i: (i, 0)),
                pl.BlockSpec((tb, S), lambda i: (i, 0)),
            ],
            out_specs=pl.BlockSpec((tb, 1), lambda i: (i, 0)),
        ),
        compiler_params=pltpu.CompilerParams(
            dimension_semantics=("parallel",),
            vmem_limit_bytes=vmem_limit),
    )(predictions, label_batch)

    # O(B) epilogue in plain JAX: per-sentence normalization + batch average.
    rank_loss = per_row[:B, 0]
    lens = length_batch.astype(jnp.float32)
    nonzero = lens != 0.0
    total_sents = jnp.sum(nonzero).astype(jnp.float32)
    sq = jnp.where(nonzero, lens * lens, 1.0)
    normalized = jnp.where(nonzero, rank_loss / sq, 0.0)
    batch_loss = jnp.where(total_sents > 0.0,
                           jnp.sum(normalized) / total_sents,
                           jnp.float32(0.0))
    return batch_loss, total_sents


def _reference(predictions, label_batch, length_batch):
    """Pure-JAX transcription of the PyTorch RankDepthLoss.forward."""
    P = predictions.astype(jnp.float32)
    L = label_batch.astype(jnp.float32)
    lens = length_batch.astype(jnp.float32)
    labels_1s = (L != -1).astype(jnp.float32)
    Pm = P * labels_1s
    Lm = L * labels_1s
    total_sents = jnp.sum(lens != 0).astype(jnp.float32)
    sq_lengths = lens ** 2
    seq_len = P.shape[1]
    rank_loss = Pm[:, 0] * 0.0
    for m in range(seq_len - 1):
        pred_diff = Pm[:, m][:, None] - Pm[:, m + 1:]
        label_diff = Lm[:, m][:, None] - Lm[:, m + 1:]
        diff_mul = jnp.sign(label_diff)
        rank_loss = rank_loss + jnp.sum(
            jnp.maximum(1.0 - diff_mul * pred_diff, 0.0) * labels_1s[:, m + 1:],
            axis=1)
    normalized = rank_loss / sq_lengths
    batch_loss = jnp.where(total_sents > 0,
                           jnp.sum(normalized) / total_sents,
                           jnp.float32(0.0))
    return batch_loss, total_sents


if __name__ == "__main__":
    key = jax.random.PRNGKey(0)
    B, S = 2, 8  # batch of 2 sentences, max sequence length 8

    kp, kl = jax.random.split(key, 2)
    predictions = jax.random.normal(kp, (B, S), dtype=jnp.float32) * 2.0
    true_depths = jnp.abs(jax.random.normal(kl, (B, S), dtype=jnp.float32)) * 3.0
    # Deterministic sentence lengths; pad positions get label -1 (ignored).
    lengths = jnp.array([6, 4], dtype=jnp.int32)
    pos = jnp.arange(S)[None, :]                       # (1, S)
    pad_mask = pos >= lengths[:, None]                 # (B, S) True on padding
    label_batch = jnp.where(pad_mask, -1.0, true_depths)

    batch_loss, total_sents = rank_depth_loss(predictions, label_batch, lengths)
    jax.block_until_ready((batch_loss, total_sents))

    ref_loss, ref_sents = _reference(predictions, label_batch, lengths)
    assert jnp.allclose(batch_loss, ref_loss, rtol=1e-5, atol=1e-5), (
        batch_loss, ref_loss)
    assert jnp.allclose(total_sents, ref_sents), (total_sents, ref_sents)

    print("KERNEL_OK")
</pallas_src>

<mosaic_0001>
module attributes {stable_mosaic.version = 11 : i64} {
  func.func @kernel(%arg0: i32, %arg1: memref<8x8xf32, #tpu.memory_space<vmem>>, %arg2: memref<8x8xf32, #tpu.memory_space<vmem>>, %arg3: memref<8x1xf32, #tpu.memory_space<vmem>>) attributes {dimension_semantics = [#tpu.dimension_semantics<parallel>], iteration_bounds = array<i64: 1>, scalar_prefetch = 0 : i64, scratch_operands = 0 : i64, tpu.core_type = #tpu.core_type<tc>, window_params = [{transform_indices = @transform_0, window_bounds = array<i64: 8, 8>}, {transform_indices = @transform_1, window_bounds = array<i64: 8, 8>}, {transform_indices = @transform_2, window_bounds = array<i64: 8, 1>}]} {
    %c0 = arith.constant 0 : index
    %c0_0 = arith.constant 0 : index
    %0 = vector.load %arg1[%c0, %c0_0] : memref<8x8xf32, #tpu.memory_space<vmem>>, vector<8x8xf32>
    %c0_1 = arith.constant 0 : index
    %c0_2 = arith.constant 0 : index
    %1 = vector.load %arg2[%c0_1, %c0_2] : memref<8x8xf32, #tpu.memory_space<vmem>>, vector<8x8xf32>
    %cst = arith.constant -1.000000e+00 : f32
    %2 = vector.broadcast %cst : f32 to vector<8x8xf32>
    %3 = arith.cmpf one, %1, %2 : vector<8x8xf32>
    %cst_3 = arith.constant 0.000000e+00 : f32
    %4 = vector.broadcast %cst_3 : f32 to vector<8x8xf32>
    %5 = arith.select %3, %0, %4 : vector<8x8xi1>, vector<8x8xf32>
    %cst_4 = arith.constant 0.000000e+00 : f32
    %6 = vector.broadcast %cst_4 : f32 to vector<8x8xf32>
    %7 = arith.select %3, %1, %6 : vector<8x8xi1>, vector<8x8xf32>
    %cst_5 = arith.constant 0.000000e+00 : f32
    %8 = vector.broadcast %cst_5 : f32 to vector<8xf32>
    %9 = vector.shape_cast %5 : vector<8x8xf32> to vector<8x8x1xf32>
    %10 = vector.shape_cast %5 : vector<8x8xf32> to vector<8x1x8xf32>
    %11 = vector.broadcast %9 : vector<8x8x1xf32> to vector<8x8x8xf32>
    %12 = vector.broadcast %10 : vector<8x1x8xf32> to vector<8x8x8xf32>
    %13 = arith.subf %11, %12 : vector<8x8x8xf32>
    %14 = vector.shape_cast %7 : vector<8x8xf32> to vector<8x8x1xf32>
    %15 = vector.shape_cast %7 : vector<8x8xf32> to vector<8x1x8xf32>
    %16 = vector.broadcast %14 : vector<8x8x1xf32> to vector<8x8x8xf32>
    %17 = vector.broadcast %15 : vector<8x1x8xf32> to vector<8x8x8xf32>
    %18 = arith.subf %16, %17 : vector<8x8x8xf32>
    %cst_6 = arith.constant 0.000000e+00 : f32
    %19 = vector.broadcast %cst_6 : f32 to vector<8x8x8xf32>
    %20 = arith.cmpf ogt, %18, %19 : vector<8x8x8xf32>
    %cst_7 = arith.constant 0.000000e+00 : f32
    %21 = vector.broadcast %cst_7 : f32 to vector<8x8x8xf32>
    %22 = arith.cmpf olt, %18, %21 : vector<8x8x8xf32>
    %cst_8 = arith.constant 0.000000e+00 : f32
    %23 = vector.broadcast %cst_8 : f32 to vector<8x8x8xf32>
    %24 = arith.subf %23, %13 : vector<8x8x8xf32>
    %cst_9 = arith.constant 0.000000e+00 : f32
    %25 = vector.broadcast %cst_9 : f32 to vector<8x8x8xf32>
    %26 = arith.select %22, %24, %25 : vector<8x8x8xi1>, vector<8x8x8xf32>
    %27 = arith.select %20, %13, %26 : vector<8x8x8xi1>, vector<8x8x8xf32>
    %cst_10 = arith.constant 1.000000e+00 : f32
    %28 = vector.broadcast %cst_10 : f32 to vector<8x8x8xf32>
    %29 = arith.subf %28, %27 : vector<8x8x8xf32>
    %cst_11 = arith.constant 0.000000e+00 : f32
    %30 = vector.broadcast %cst_11 : f32 to vector<8x8x8xf32>
    %31 = arith.maximumf %29, %30 : vector<8x8x8xf32>
    %32 = tpu.iota {dimensions = array<i32: 0>} : vector<8x8xi32>
    %c0_i32 = arith.constant 0 : i32
    %33 = vector.broadcast %c0_i32 : i32 to vector<8x8xi32>
    %34 = arith.addi %32, %33 : vector<8x8xi32>
    %35 = tpu.iota {dimensions = array<i32: 1>} : vector<8x8xi32>
    %c0_i32_12 = arith.constant 0 : i32
    %36 = vector.broadcast %c0_i32_12 : i32 to vector<8x8xi32>
    %37 = arith.addi %35, %36 : vector<8x8xi32>
    %38 = arith.cmpi sgt, %37, %34 : vector<8x8xi32>
    %39 = vector.shape_cast %38 : vector<8x8xi1> to vector<1x8x8xi1>
    %40 = vector.shape_cast %3 : vector<8x8xi1> to vector<8x1x8xi1>
    %41 = vector.broadcast %39 : vector<1x8x8xi1> to vector<8x8x8xi1>
    %42 = vector.broadcast %40 : vector<8x1x8xi1> to vector<8x8x8xi1>
    %43 = arith.andi %41, %42 : vector<8x8x8xi1>
    %cst_13 = arith.constant 0.000000e+00 : f32
    %44 = vector.broadcast %cst_13 : f32 to vector<8x8x8xf32>
    %45 = arith.select %43, %31, %44 : vector<8x8x8xi1>, vector<8x8x8xf32>
    %cst_14 = arith.constant dense<0.000000e+00> : vector<8x8xf32>
    %46 = vector.multi_reduction <add>, %45, %cst_14 [2] : vector<8x8x8xf32> to vector<8x8xf32>
    %cst_15 = arith.constant dense<0.000000e+00> : vector<8xf32>
    %47 = vector.multi_reduction <add>, %46, %cst_15 [1] : vector<8x8xf32> to vector<8xf32>
    %48 = arith.addf %8, %47 : vector<8xf32>
    %49 = vector.shape_cast %48 : vector<8xf32> to vector<8x1xf32>
    %c0_16 = arith.constant 0 : index
    %c0_17 = arith.constant 0 : index
    %50 = vector.load %arg3[%c0_16, %c0_17] : memref<8x1xf32, #tpu.memory_space<vmem>>, vector<8x1xf32>
    tpu.vector_store %arg3[%c0_16, %c0_17], %49 {strides = array<i32>} : memref<8x1xf32, #tpu.memory_space<vmem>>, vector<8x1xf32>,
    return
  }
  func.func @transform_0(%arg0: i32) -> (i32, i32) {
    %c0_i32 = arith.constant 0 : i32
    %c0_i32_0 = arith.constant 0 : i32
    return %arg0, %c0_i32 : i32, i32
  }
  func.func @transform_1(%arg0: i32) -> (i32, i32) {
    %c0_i32 = arith.constant 0 : i32
    %c0_i32_0 = arith.constant 0 : i32
    return %arg0, %c0_i32 : i32, i32
  }
  func.func @transform_2(%arg0: i32) -> (i32, i32) {
    %c0_i32 = arith.constant 0 : i32
    %c0_i32_0 = arith.constant 0 : i32
    return %arg0, %c0_i32 : i32, i32
  }
}

</mosaic_0001>

<bundles_post_ra>
// kernel: tpu_custom_call.1
= control target key start
LH: loop header
LB: loop body
LE: loop exit
PB: predicated region body
PF: predicated region fallthrough
CT: control target
= control target key end

     0   :  { %7 = vsyncpa [#allocation3], 0  ;;  %s1066_s0 = inlined_call_operand.hbm [shape: f32[8,8], index: 0, kind: input, shape index: {}]   ;;  %s1067_s1 = inlined_call_operand.hbm [shape: f32[8,8], index: 1, kind: input, shape index: {}]   ;;  %s1068_s2 = inlined_call_operand.vmem [shape: f32[8,1], index: 2, kind: output, shape index: {}]  }
   0x1   :  { %8 = vsyncpa [#allocation5], 0  ;;  %s677_s9 = smov [#allocation2]   ;;  %s678_s11 = smov [#allocation4]  }
   0x2   :  { %s15_s10 = sshll.u32 %s677_s9, 4  ;;  %s25_s12 = sshll.u32 %s678_s11, 4  ;;  %s16_s10 = int_to_ptr.vmem [resolvable:$true] %s15_s10  ;;  %s26_s12 = int_to_ptr.vmem [resolvable:$true] %s25_s12 }
   0x3   :  { %s629_s15 = scalar_lea.hbm %s1066_s0, 128 }
   0x4   :  { %p630_p0 = scmp.ne.s32.totalorder %s1066_s0, %s629_s15  ;;  %p633_p1 = scmp.lt.u32.totalorder %s629_s15, %s1066_s0 }
   0x6   :  { %p635_p2 = pnand %p633_p1, %p630_p0 }
   0x8   :  { %638 = shalt.err (!%p635_p2)
}
   0x9   :  { %s639_s20 = scalar_lea.vmem %s16_s10, 128  ;;  %p644_p4 = scmp.lt.s32.totalorder %s16_s10, %s16_s10 }
   0xa   :  { %p640_p3 = scmp.ne.s32.totalorder %s16_s10, %s639_s20  ;;  %p645_p5 = scmp.lt.s32.totalorder %s639_s20, %s639_s20 }
   0xc   :  { %p646_p6 = por %p645_p5, %p644_p4 }
   0xe   :  { %p647_p7 = pnand %p646_p6, %p640_p3 }
  0x10   :  { %650 = shalt.err (!%p647_p7)
}
  0x11   :  { %18 = dma.hbm_to_vmem [thread:$0]  %s1066_s0, 128, %s16_s10, [#allocation3]  }
  0x12   :  { %s651_s25 = scalar_lea.hbm %s1067_s1, 128 }
  0x13   :  { %p652_p8 = scmp.ne.s32.totalorder %s1067_s1, %s651_s25  ;;  %p655_p9 = scmp.lt.u32.totalorder %s651_s25, %s1067_s1 }
  0x15   :  { %p657_p10 = pnand %p655_p9, %p652_p8 }
  0x17   :  { %660 = shalt.err (!%p657_p10)
}
  0x18   :  { %s661_s30 = scalar_lea.vmem %s26_s12, 128  ;;  %p666_p12 = scmp.lt.s32.totalorder %s26_s12, %s26_s12 }
  0x19   :  { %p662_p11 = scmp.ne.s32.totalorder %s26_s12, %s661_s30  ;;  %p667_p13 = scmp.lt.s32.totalorder %s661_s30, %s661_s30 }
  0x1b   :  { %p668_p0 = por %p667_p13, %p666_p12 }
  0x1d   :  { %p669_p1 = pnand %p668_p0, %p662_p11 }
  0x1f   :  { %672 = shalt.err (!%p669_p1)
}
  0x20   :  { %28 = dma.hbm_to_vmem [thread:$0]  %s1067_s1, 128, %s26_s12, [#allocation5]  }
  0x21   :  { %673 = dma.done.wait [#allocation3], 128  }
  0x22   :  { %674 = vsyncadd [#allocation3], 4294967168 }
  0x23   :  { %675 = dma.done.wait [#allocation5], 128  }
  0x24   :  { %676 = vsyncadd [#allocation5], 4294967168  ;;  %v40_v0 = vlaneseq  ;;  %v679_v2 = vmov 1966171168   ;;  %v35_v7 = vld [vmem:[#allocation2] sm:$0xff]  ;;  %v36_v8 = vld [vmem:[#allocation4] sm:$0xff] }
  0x25   :  { %v99_v3 = vunpack.c.l.s4 %v679_v2  ;;  %vm37_vm0 = vcmp.ne.f32.partialorder %v36_v8, -1.0  ;;  %v680_v24 = vmov 0   ;;  %vm533_vm11 = vcmask 64512  }
  0x26   :  { %v720_v1 = vshrl.u32 %v40_v0, 7  ;;  %v729_v11 = vsel %vm37_vm0, %v35_v7, 0.0  ;;  %v732_v12 = vsel %vm37_vm0, %v36_v8, 0.0  ;;  %v407_v20 = vand.u32 127, %v40_v0 }
  0x27   :  { %v100_v6 = vunpack.c.0.s8 %v99_v3  ;;  %v750_v25 = vsel %vm37_vm0, 1, %v680_v24  ;;  %v97_v33 = vcombine.high %v729_v11, %v729_v11  ;;  %v251_v37 = vcombine.high %v732_v12, %v732_v12 }
  0x28   :  { %v723_v4 = vsub.s32 0, %v720_v1  ;;  %v56_v5 = vsub.s32 2, %v720_v1  ;;  %v49_v9 = vsub.s32 1, %v720_v1  ;;  %v63_v10 = vsub.s32 3, %v720_v1 }
  0x29   :  { %v70_v13 = vsub.s32 4, %v720_v1  ;;  %v77_v14 = vsub.s32 5, %v720_v1  ;;  %v738_v16 = vsub.s32 %v100_v6, %v720_v1  ;;  %v84_v18 = vsub.s32 6, %v720_v1 }
  0x2a   :  { %v57_v15 = vrot.slane %v729_v11, %v56_v5  ;;  %v43_v17 = vrot.slane %v729_v11, %v723_v4  ;;  %v197_v19 = vrot.slane %v732_v12, %v723_v4  ;;  %v50_v21 = vrot.slane %v729_v11, %v49_v9 }
  0x2b   :  { %v64_v22 = vrot.slane %v729_v11, %v63_v10  ;;  %v204_v23 = vrot.slane %v732_v12, %v49_v9  ;;  %v71_v26 = vrot.slane %v729_v11, %v70_v13  ;;  %v211_v27 = vrot.slane %v732_v12, %v56_v5 }
  0x2c   :  { %59 = vbcast.lane.b32.xlu1 %v57_v15, 256  ;;  %45 = vbcast.lane.b32.xlu0 %v43_v17, 256  ;;  %v757_v28 = vrot.slane %v729_v11, %v77_v14  ;;  %v760_v29 = vrot.slane %v732_v12, %v63_v10  ;;  %v765_v30 = vrot.slane %v729_v11, %v84_v18  ;;  %v91_v38 = vsub.s32 7, %v720_v1 }
  0x2d   :  { %v104_v31 = vrot.slane %v729_v11, %v738_v16  ;;  %v258_v32 = vrot.slane %v732_v12, %v738_v16  ;;  %v774_v34 = vrot.slane %v732_v12, %v70_v13  ;;  %vm777_vm1 = vcmp.gt.s32.totalorder %v407_v20, %v720_v1 }
  0x2e   :  { %v417_v36 = vrot.slane %v750_v25, %v738_v16  ;;  %v111_v43 = vrot.slane %v97_v33, %v738_v16  ;;  %v795_v45 = vsub.s32 %v407_v20, %v720_v1  ;;  %v265_v6 = vrot.slane %v251_v37, %v738_v16 }
  0x2f   :  { %v787_v39 = vrot.slane %v104_v31, %v738_v16  ;;  %v790_v40 = vrot.slane %v258_v32, %v738_v16  ;;  %v112_v41 = vcombine.high %v104_v31, %v104_v31  ;;  %v266_v42 = vcombine.high %v258_v32, %v258_v32 }
  0x30   :  { %199 = vbcast.lane.b32.xlu1 %v197_v19, 256  ;;  %52 = vbcast.lane.b32.xlu0 %v50_v21, 256  ;;  %v433_v44 = vrot.slane %v417_v36, %v738_v16  ;;  %v810_v51 = vrot.slane %v111_v43, %v738_v16  ;;  %v113_v53 = vcombine.high %v111_v43, %v111_v43 }
  0x31   :  { %v142_v46 = vcombine.high %v787_v39, %v787_v39  ;;  %v149_v47 = vrot.slane %v787_v39, %v723_v4  ;;  %v303_v48 = vrot.slane %v790_v40, %v723_v4  ;;  %v804_v49 = vrot.slane %v112_v41, %v738_v16 }
  0x32   :  { %v807_v50 = vrot.slane %v266_v42, %v738_v16  ;;  %v296_v52 = vcombine.high %v790_v40, %v790_v40  ;;  %vm459_vm2 = vcmp.ne.s32.totalorder %v433_v44, 0  ;;  %v165_v58 = vrot.slane %v810_v51, %v723_v4 }
  0x33   :  { %v815_v54 = vrot.slane %v142_v46, %v723_v4  ;;  %v153_v55 = vrot.slane %v804_v49, %v723_v4  ;;  %v144_v56 = vcombine.high %v804_v49, %v804_v49  ;;  %v829_v60 = vrot.slane %v113_v53, %v738_v16 }
  0x34   :  { %66 = vbcast.lane.b32.xlu1 %v64_v22, 256  ;;  %206 = vbcast.lane.b32.xlu0 %v204_v23, 256  ;;  %v307_v57 = vrot.slane %v807_v50, %v723_v4  ;;  %v826_v59 = vrot.slane %v296_v52, %v723_v4  ;;  %v469_v62 = vsel %vm459_vm2, 1, %v680_v24  ;;  %v298_v63 = vcombine.high %v807_v50, %v807_v50 }
  0x35   :  { %v832_v61 = vrot.slane %v144_v56, %v723_v4  ;;  %v143_v0 = vcombine.high %v810_v51, %v810_v51  ;;  %v169_v2 = vrot.slane %v829_v60, %v723_v4  ;;  %v480_v3 = vrot.slane %v469_v62, %v723_v4 }
  0x36   :  { %v425_v5 = vcombine.high %v417_v36, %v417_v36  ;;  %v844_v7 = vrot.slane %v298_v63, %v723_v4  ;;  %v145_v9 = vcombine.high %v829_v60, %v829_v60  ;;  %v857_v15 = vrot.slane %v265_v6, %v738_v16 }
  0x37   :  { %v847_v8 = vrot.slane %v143_v0, %v723_v4  ;;  %vm851_vm3 = vcmp.eq.s32.totalorder %v480_v3, 1  ;;  %v455_v17 = vcombine.high %v433_v44, %v433_v44  ;;  %v92_v19 = vrot.slane %v729_v11, %v91_v38 }
  0x38   :  { %73 = vbcast.lane.b32.xlu1 %v71_v26, 256  ;;  %213 = vbcast.lane.b32.xlu0 %v211_v27, 256  ;;  %v447_v13 = vrot.slane %v425_v5, %v738_v16  ;;  %vm517_vm4 = vmand %vm777_vm1, %vm851_vm3  ;;  %v867_v20 = vrot.slane %v145_v9, %v723_v4  ;;  %v267_v21 = vcombine.high %v265_v6, %v265_v6 }
  0x39   :  { %v410_v22 = vcombine.high %v750_v25, %v750_v25  ;;  %v319_v23 = vrot.slane %v857_v15, %v723_v4  ;;  %vm461_vm6 = vcmp.ne.s32.totalorder %v455_v17, 0  ;;  %v297_v25 = vcombine.high %v857_v15, %v857_v15 }
  0x3a   :  { %vm460_vm5 = vcmp.ne.s32.totalorder %v447_v13, 0  ;;  %v457_v26 = vcombine.high %v447_v13, %v447_v13  ;;  %v471_v27 = vsel %vm461_vm6, 1, %v680_v24  ;;  %v878_v31 = vrot.slane %v267_v21, %v738_v16 }
  0x3b   :  { %v470_v11 = vsel %vm460_vm5, 1, %v680_v24  ;;  %v488_v33 = vrot.slane %v471_v27, %v723_v4  ;;  %v424_v36 = vrot.slane %v410_v22, %v738_v16  ;;  %v891_v41 = vrot.slane %v297_v25, %v723_v4 }
  0x3c   :  { %80 = vbcast.lane.b32.xlu1 %v757_v28, 256  ;;  %220 = vbcast.lane.b32.xlu0 %v760_v29, 256  ;;  %v484_v32 = vrot.slane %v470_v11, %v723_v4  ;;  %vm462_vm7 = vcmp.ne.s32.totalorder %v457_v26, 0  ;;  %v323_v28 = vrot.slane %v878_v31, %v723_v4  ;;  %v299_v29 = vcombine.high %v878_v31, %v878_v31 }
  0x3d   :  { %v472_v37 = vsel %vm462_vm7, 1, %v680_v24  ;;  %vm897_vm9 = vcmp.eq.s32.totalorder %v488_v33, 1  ;;  %v440_v46 = vrot.slane %v424_v36, %v738_v16  ;;  %v232_v52 = vrot.slane %v732_v12, %v77_v14 }
  0x3e   :  { %vm893_vm8 = vcmp.eq.s32.totalorder %v484_v32, 1  ;;  %v492_v44 = vrot.slane %v472_v37, %v723_v4  ;;  %v913_v53 = vrot.slane %v299_v29, %v723_v4  ;;  %v426_v56 = vcombine.high %v424_v36, %v424_v36 }
  0x3f   :  { %vm518_vm10 = vmand %vm777_vm1, %vm893_vm8  ;;  %vm463_vm13 = vcmp.ne.s32.totalorder %v440_v46, 0  ;;  %v456_v14 = vcombine.high %v440_v46, %v440_v46  ;;  %v246_v63 = vrot.slane %v732_v12, %v91_v38  ;;  %v239_v3 = vrot.slane %v732_v12, %v84_v18 }
  0x40   :  { %87 = vbcast.lane.b32.xlu1 %v765_v30, 256  ;;  %227 = vbcast.lane.b32.xlu0 %v774_v34, 256  ;;  %vm919_vm12 = vcmp.eq.s32.totalorder %v492_v44, 1  ;;  %v473_v34 = vsel %vm463_vm13, 1, %v680_v24  ;;  %v454_v62 = vrot.slane %v426_v56, %v738_v16  ;;  %vm1087_vm8 = vmand %vm777_vm1, %vm897_vm9 }
  0x41   :  { %v496_v0 = vrot.slane %v473_v34, %v723_v4  ;;  %vm465_vm15 = vcmp.ne.s32.totalorder %v456_v14, 0  ;;  %vm1088_vm9 = vmand %vm777_vm1, %vm919_vm12 }
  0x42   :  { %vm464_vm0 = vcmp.ne.s32.totalorder %v454_v62, 0  ;;  %v458_v5 = vcombine.high %v454_v62, %v454_v62  ;;  %v475_v6 = vsel %vm465_vm15, 1, %v680_v24 }
  0x43   :  { %vm937_vm2 = vcmp.eq.s32.totalorder %v496_v0, 1  ;;  %v474_v16 = vsel %vm464_vm0, 1, %v680_v24  ;;  %v504_v38 = vrot.slane %v475_v6, %v723_v4 }
  0x44   :  { %94 = vbcast.lane.b32.xlu1 %v92_v19, 256  ;;  %234 = vbcast.lane.b32.xlu0 %v232_v52, 256  ;;  %v500_v1 = vrot.slane %v474_v16, %v723_v4  ;;  %vm466_vm6 = vcmp.ne.s32.totalorder %v458_v5, 0  ;;  %vm1089_vm12 = vmand %vm777_vm1, %vm937_vm2 }
  0x45   :  { %v476_v12 = vsel %vm466_vm6, 1, %v680_v24  ;;  %vm949_vm7 = vcmp.eq.s32.totalorder %v504_v38, 1 }
  0x46   :  { %vm953_vm13 = vcmp.eq.s32.totalorder %v500_v1, 1  ;;  %v508_v17 = vrot.slane %v476_v12, %v723_v4 }
  0x48   :  { %248 = vbcast.lane.b32.xlu1 %v246_v63, 256  ;;  %241 = vbcast.lane.b32.xlu0 %v239_v3, 256  ;;  %vm966_vm6 = vcmp.eq.s32.totalorder %v508_v17, 1 }
  0x49   :  { %vm1091_vm2 = vmand %vm777_vm1, %vm966_vm6  ;;  %vm604_vm6 = vcmask 1044484  }
  0x9e   :  { %v60_v19 = vpop.permute.xlu1 %59  ;;  %v46_v21 = vpop.permute.xlu0 %45 }
  0x9f   :  { %v186_v22 = vsub.f32 %v46_v21, %v149_v47  ;;  %v188_v37 = vsub.f32 %v60_v19, %v815_v54 }
  0xa1   :  { %v364_v25 = vsub.f32 0.0, %v186_v22  ;;  %v366_v14 = vsub.f32 0.0, %v188_v37 }
  0xa2   :  { %v200_v26 = vpop.permute.xlu1 %199  ;;  %v53_v11 = vpop.permute.xlu0 %52 }
  0xa3   :  { %v340_v27 = vsub.f32 %v200_v26, %v303_v48  ;;  %v187_v32 = vsub.f32 %v53_v11, %v153_v55 }
  0xa5   :  { %vm348_vm15 = vcmp.gt.f32.partialorder %v340_v27, 0.0  ;;  %vm356_vm0 = vcmp.lt.f32.partialorder %v340_v27, 0.0  ;;  %v365_v44 = vsub.f32 0.0, %v187_v32 }
  0xa6   :  { %v372_v33 = vsel %vm356_vm0, %v364_v25, 0.0  ;;  %v67_v36 = vpop.permute.xlu1 %66  ;;  %v207_v29 = vpop.permute.xlu0 %206 }
  0xa7   :  { %v341_v39 = vsub.f32 %v207_v29, %v307_v57  ;;  %v380_v47 = vsel %vm348_vm15, %v186_v22, %v372_v33  ;;  %v189_v34 = vsub.f32 %v67_v36, %v832_v61 }
  0xa8   :  { %v388_v40 = vsub.f32 1.0, %v380_v47 }
  0xa9   :  { %vm349_vm5 = vcmp.gt.f32.partialorder %v341_v39, 0.0  ;;  %vm357_vm14 = vcmp.lt.f32.partialorder %v341_v39, 0.0  ;;  %v367_v61 = vsub.f32 0.0, %v189_v34 }
  0xaa   :  { %v373_v48 = vsel %vm357_vm14, %v365_v44, 0.0  ;;  %v74_v46 = vpop.permute.xlu1 %73  ;;  %v214_v49 = vpop.permute.xlu0 %213  ;;  %v396_v55 = vmax.f32 %v388_v40, 0.0 }
  0xab   :  { %v342_v52 = vsub.f32 %v214_v49, %v826_v59  ;;  %v381_v56 = vsel %vm349_vm5, %v187_v32, %v373_v48  ;;  %v190_v10 = vsub.f32 %v74_v46, %v165_v58 }
  0xac   :  { %v525_v50 = vsel %vm517_vm4, %v396_v55, 0.0  ;;  %v389_v54 = vsub.f32 1.0, %v381_v56 }
  0xad   :  { %vm350_vm15 = vcmp.gt.f32.partialorder %v342_v52, 0.0  ;;  %vm358_vm0 = vcmp.lt.f32.partialorder %v342_v52, 0.0  ;;  %v534_v57 = vsel %vm533_vm11, %v525_v50, 0.0  ;;  %v368_v19 = vsub.f32 0.0, %v190_v10 }
  0xae   :  { %v374_v62 = vsel %vm358_vm0, %v366_v14, 0.0  ;;  %v81_v63 = vpop.permute.xlu1 %80  ;;  %535 = vadd.xlane.f32.xlu0 %v534_v57  ;;  %v221_v0 = vpop.permute.xlu0 %220  ;;  %v397_v59 = vmax.f32 %v389_v54, 0.0 }
  0xaf   :  { %v343_v3 = vsub.f32 %v221_v0, %v844_v7  ;;  %v382_v5 = vsel %vm350_vm15, %v188_v37, %v374_v62  ;;  %v191_v51 = vsub.f32 %v81_v63, %v169_v2 }
  0xb0   :  { %v526_v6 = vsel %vm518_vm10, %v397_v59, 0.0  ;;  %v390_v16 = vsub.f32 1.0, %v382_v5 }
  0xb1   :  { %vm351_vm3 = vcmp.gt.f32.partialorder %v343_v3, 0.0  ;;  %vm359_vm4 = vcmp.lt.f32.partialorder %v343_v3, 0.0  ;;  %v537_v38 = vsel %vm533_vm11, %v526_v6, 0.0  ;;  %v369_v15 = vsub.f32 0.0, %v191_v51 }
  0xb2   :  { %v375_v1 = vsel %vm359_vm4, %v367_v61, 0.0  ;;  %v88_v12 = vpop.permute.xlu1 %87  ;;  %538 = vadd.xlane.f32.xlu1 %v537_v38  ;;  %v228_v7 = vpop.permute.xlu0 %227  ;;  %v398_v17 = vmax.f32 %v390_v16, 0.0 }
  0xb3   :  { %v344_v58 = vsub.f32 %v228_v7, %v319_v23  ;;  %v383_v42 = vsel %vm351_vm3, %v189_v34, %v375_v1  ;;  %v192_v43 = vsub.f32 %v88_v12, %v847_v8 }
  0xb4   :  { %v527_v21 = vsel %vm1087_vm8, %v398_v17, 0.0  ;;  %v391_v22 = vsub.f32 1.0, %v383_v42 }
  0xb5   :  { %vm352_vm10 = vcmp.gt.f32.partialorder %v344_v58, 0.0  ;;  %vm360_vm14 = vcmp.lt.f32.partialorder %v344_v58, 0.0  ;;  %v540_v26 = vsel %vm533_vm11, %v527_v21, 0.0  ;;  %v370_v37 = vsub.f32 0.0, %v192_v43 }
  0xb6   :  { %v376_v11 = vsel %vm360_vm14, %v368_v19, 0.0  ;;  %v95_v60 = vpop.permute.xlu1 %94  ;;  %541 = vadd.xlane.f32.xlu0 %v540_v26  ;;  %v235_v2 = vpop.permute.xlu0 %234  ;;  %v399_v27 = vmax.f32 %v391_v22, 0.0  ;;  %vm1092_vm14 = vmand %vm777_vm1, %vm949_vm7  ;;  %vm602_vm7 = vcmask 1043459  }
  0xb7   :  { %v345_v23 = vsub.f32 %v235_v2, %v323_v28  ;;  %v384_v25 = vsel %vm352_vm10, %v190_v10, %v376_v11  ;;  %v193_v32 = vsub.f32 %v95_v60, %v867_v20  ;;  %vm1090_vm10 = vmand %vm777_vm1, %vm953_vm13  ;;  %vm598_vm13 = vcmask 1041409  }
  0xb8   :  { %v528_v33 = vsel %vm1088_vm9, %v399_v27, 0.0  ;;  %v392_v36 = vsub.f32 1.0, %v384_v25  ;;  %vm600_vm1 = vcmask 1042434   ;;  %vm606_vm9 = vcmask 1045509  }
  0xb9   :  { %vm353_vm5 = vcmp.gt.f32.partialorder %v345_v23, 0.0  ;;  %vm361_vm15 = vcmp.lt.f32.partialorder %v345_v23, 0.0  ;;  %v543_v29 = vsel %vm533_vm11, %v528_v33, 0.0  ;;  %v371_v44 = vsub.f32 0.0, %v193_v32 }
  0xba   :  { %v377_v39 = vsel %vm361_vm15, %v369_v15, 0.0  ;;  %v249_v47 = vpop.permute.xlu1 %248  ;;  %544 = vadd.xlane.f32.xlu0 %v543_v29  ;;  %v242_v4 = vpop.permute.xlu0 %241  ;;  %v400_v31 = vmax.f32 %v392_v36, 0.0  ;;  %vm610_vm15 = vcmask 1047559  }
  0xbb   :  { %v347_v8 = vsub.f32 %v249_v47, %v913_v53  ;;  %v346_v20 = vsub.f32 %v242_v4, %v891_v41  ;;  %v385_v28 = vsel %vm353_vm5, %v191_v51, %v377_v39  ;;  %vm608_vm5 = vcmask 1046534  }
  0xbc   :  { %v529_v30 = vsel %vm1089_vm12, %v400_v31, 0.0  ;;  %v393_v40 = vsub.f32 1.0, %v385_v28  ;;  %vm617_vm12 = vcmask 7168  }
  0xbd   :  { %vm355_vm0 = vcmp.gt.f32.partialorder %v347_v8, 0.0  ;;  %vm363_vm3 = vcmp.lt.f32.partialorder %v347_v8, 0.0  ;;  %vm354_vm4 = vcmp.gt.f32.partialorder %v346_v20, 0.0  ;;  %vm362_vm8 = vcmp.lt.f32.partialorder %v346_v20, 0.0 }
  0xbe   :  { %v379_v48 = vsel %vm363_vm3, %v371_v44, 0.0  ;;  %v378_v46 = vsel %vm362_vm8, %v370_v37, 0.0  ;;  %v546_v53 = vsel %vm533_vm11, %v529_v30, 0.0  ;;  %v401_v49 = vmax.f32 %v393_v40, 0.0 }
  0xbf   :  { %547 = vadd.xlane.f32.xlu1 %v546_v53  ;;  %v387_v41 = vsel %vm355_vm0, %v193_v32, %v379_v48  ;;  %v386_v55 = vsel %vm354_vm4, %v192_v43, %v378_v46 }
  0xc0   :  { %v530_v9 = vsel %vm1090_vm10, %v401_v49, 0.0  ;;  %v395_v52 = vsub.f32 1.0, %v387_v41  ;;  %v394_v56 = vsub.f32 1.0, %v386_v55 }
  0xc1   :  { %v549_v14 = vsel %vm533_vm11, %v530_v9, 0.0 }
  0xc2   :  { %550 = vadd.xlane.f32.xlu0 %v549_v14  ;;  %v403_v34 = vmax.f32 %v395_v52, 0.0  ;;  %v402_v50 = vmax.f32 %v394_v56, 0.0 }
  0xc4   :  { %v532_v54 = vsel %vm1091_vm2, %v403_v34, 0.0  ;;  %v531_v13 = vsel %vm1092_vm14, %v402_v50, 0.0 }
  0xc5   :  { %v555_v57 = vsel %vm533_vm11, %v532_v54, 0.0  ;;  %v552_v62 = vsel %vm533_vm11, %v531_v13, 0.0 }
  0xc6   :  { %556 = vadd.xlane.f32.xlu0 %v555_v57  ;;  %553 = vadd.xlane.f32.xlu1 %v552_v62 }
 0x13b   :  { %v536_v63 = vpop.xlane.xlu0 %535 }
 0x13c   :  { %v569_v18 = vrot.slane %v536_v63, %v795_v45 }
 0x13f   :  { %v539_v59 = vpop.xlane.xlu1 %538 }
 0x140   :  { %v573_v24 = vrot.slane %v539_v59, %v795_v45 }
 0x142   :  { %v599_v16 = vsel %vm598_vm13, %v573_v24, %v569_v18 }
 0x143   :  { %v542_v0 = vpop.xlane.xlu0 %541 }
 0x144   :  { %v577_v35 = vrot.slane %v542_v0, %v795_v45 }
 0x146   :  { %v601_v1 = vsel %vm600_vm1, %v577_v35, %v599_v16 }
 0x147   :  { %v545_v3 = vpop.xlane.xlu0 %544 }
 0x148   :  { %v581_v61 = vrot.slane %v545_v3, %v795_v45 }
 0x14a   :  { %v603_v12 = vsel %vm602_vm7, %v581_v61, %v601_v1 }
 0x14c   :  { %v548_v5 = vpop.xlane.xlu1 %547 }
 0x14d   :  { %v585_v6 = vrot.slane %v548_v5, %v795_v45 }
 0x14f   :  { %v551_v10 = vpop.xlane.xlu0 %550  ;;  %v605_v51 = vsel %vm604_vm6, %v585_v6, %v603_v12 }
 0x150   :  { %v589_v38 = vrot.slane %v551_v10, %v795_v45 }
 0x152   :  { %v607_v19 = vsel %vm606_vm9, %v589_v38, %v605_v51 }
 0x153   :  { %v554_v7 = vpop.xlane.xlu1 %553  ;;  %v557_v17 = vpop.xlane.xlu0 %556 }
 0x154   :  { %v593_v58 = vrot.slane %v554_v7, %v795_v45  ;;  %v597_v42 = vrot.slane %v557_v17, %v795_v45 }
 0x156   :  { %v609_v21 = vsel %vm608_vm5, %v593_v58, %v607_v19 }
 0x157   :  { %v611_v22 = vsel %vm610_vm15, %v597_v42, %v609_v21 }
 0x158   :  { %v613_v26 = vsel %vm533_vm11, %v611_v22, 0.0 }
 0x159   :  { %614 = vadd.xlane.f32.xlu1 %v613_v26 }
 0x1e6   :  { %v615_v11 = vpop.xlane.xlu1 %614 }
 0x1e7   :  { %618 = vst.msk [vmem:[%s1068_s2] sm:$0xff] %vm617_vm12, %v615_v11 }
 0x1e8   :  { %623 = vsyncpa [#allocation3], 1 }
 0x1e9   :  { %624 = vsyncpa [#allocation5], 1 }

</bundles_post_ra>
